<compile_context>
chip_gen: v5e
topology: v5e:2x2
jax: 0.10.0
libtpu: 0.0.40
codegen_flags: <defaults>
</compile_context>

<pallas_src>
import math
import jax
import jax.numpy as jnp
import numpy as np
from jax.experimental import pallas as pl
from jax.experimental.pallas import tpu as pltpu

# ---------------- configuration (small, consistent with the module) ----------------
B = 2            # batch
N = 32           # sequence length (>= 16 so the chunked split is valid)
D = 64           # dim / n_feat
H = 8            # num_heads
HD = D // H      # head dim
HID = D // 4     # mlp hidden
CS = max(1, math.ceil(N // 16))   # attention chunk size (== 2 here)
SCALE = HD ** (-0.5)
EPS = 1e-5

NUM_ROW_BLOCKS = 2               # grid size: >=2 "parallel" steps so both v7x TCs are used


def _head_sum_matrix(d, hd):
    """(D, D) 0/1 matrix: (x @ M)[:, e] = sum of x over the head-group containing lane e."""
    idx = np.arange(d)
    return (idx[:, None] // hd == idx[None, :] // hd).astype(np.float32)


def _chunk_partner_perms(rb, cs):
    """(max(cs-1,1), rb, rb) permutations; perm[o-1] @ x -> row at within-chunk offset +o."""
    idx = np.arange(rb)
    chunk, pos = idx // cs, idx % cs
    mats = []
    for o in range(1, cs):
        tgt = chunk * cs + (pos + o) % cs
        m = np.zeros((rb, rb), np.float32)
        m[idx, tgt] = 1.0
        mats.append(m)
    if not mats:                       # cs == 1: dummy (never read by the kernel)
        mats = [np.eye(rb, dtype=np.float32)]
    return np.stack(mats)


def transblock_kernel(x_ref, g1_ref, be1_ref, wq_ref, wk_ref, wv_ref,
                      wp_ref, bp_ref, g2_ref, be2_ref, w1_ref, b1_ref,
                      w2_ref, b2_ref, hsum_ref, perms_ref, o_ref):
    x = x_ref[...].astype(jnp.float32)                                     # (RB, D)

    # ---- LayerNorm 1 ----
    mu = jnp.mean(x, axis=-1, keepdims=True)
    xc = x - mu
    var = jnp.mean(xc * xc, axis=-1, keepdims=True)
    xn = xc * jax.lax.rsqrt(var + EPS) * g1_ref[...] + be1_ref[...]

    # ---- EffAttention (chunk-local, CS tokens per chunk) ----
    # reduce Linear + qk scale are folded into wq/wk/wv on the host.
    q = jnp.dot(xn, wq_ref[...], preferred_element_type=jnp.float32)       # (RB, D)
    k = jnp.dot(xn, wk_ref[...], preferred_element_type=jnp.float32)
    v = jnp.dot(xn, wv_ref[...], preferred_element_type=jnp.float32)

    hsum = hsum_ref[...]   # (D, D) block-diagonal ones: per-head sum, broadcast over the head's lanes

    # Within-chunk scores: one score per (row, head, chunk-offset), broadcast across the head's HD
    # lanes so all softmax math stays in dense 2-D (RB, D) tiles (no (H,N,N) tensor, no mask).
    s_off = [jnp.dot(q * k, hsum, preferred_element_type=jnp.float32)]     # offset 0: own row
    v_off = [v]
    for o in range(1, CS):
        p_o = perms_ref[o - 1]                                             # (RB, RB) partner permutation
        k_o = jnp.dot(p_o, k, preferred_element_type=jnp.float32)
        v_off.append(jnp.dot(p_o, v, preferred_element_type=jnp.float32))
        s_off.append(jnp.dot(q * k_o, hsum, preferred_element_type=jnp.float32))

    m = s_off[0]
    for s in s_off[1:]:
        m = jnp.maximum(m, s)
    e_off = [jnp.exp(s - m) for s in s_off]
    z = e_off[0]
    for e in e_off[1:]:
        z = z + e
    num = e_off[0] * v_off[0]
    for e, vo in zip(e_off[1:], v_off[1:]):
        num = num + e * vo
    attn = num * pl.reciprocal(z, approx=True)                             # (RB, D)

    attn = jnp.dot(attn, wp_ref[...], preferred_element_type=jnp.float32) + bp_ref[...]
    x1 = x + attn

    # ---- LayerNorm 2 ----
    mu2 = jnp.mean(x1, axis=-1, keepdims=True)
    xc2 = x1 - mu2
    var2 = jnp.mean(xc2 * xc2, axis=-1, keepdims=True)
    xn2 = xc2 * jax.lax.rsqrt(var2 + EPS) * g2_ref[...] + be2_ref[...]

    # ---- Mlp: fc1 -> ReLU -> fc2 ----
    hmid = jnp.dot(xn2, w1_ref[...], preferred_element_type=jnp.float32) + b1_ref[...]
    hmid = jnp.maximum(hmid, 0.0)
    mlp_out = jnp.dot(hmid, w2_ref[...], preferred_element_type=jnp.float32) + b2_ref[...]

    o_ref[...] = (x1 + mlp_out).astype(o_ref.dtype)


def transblock(x, params):
    (g1, be1, wr, wqkv, wp, bp, g2, be2, w1, b1, w2, b2) = params
    Bx, Nx, Dx = x.shape
    R = Bx * Nx                          # fold batch into the matmul rows
    RB = R // NUM_ROW_BLOCKS             # rows per grid step
    assert R % NUM_ROW_BLOCKS == 0 and RB % 8 == 0
    assert Nx % CS == 0 and RB % CS == 0  # attention chunks never cross batch/block boundaries

    # Host-side weight prep (free / XLA side):
    #   reduce Linear folded into q/k/v:  q = h @ Wq.T,  h = xn @ Wr.T  =>  q = xn @ (Wr.T @ Wq.T)
    #   qk scale folded into the q weight.
    wr_t = wr.T
    wq_t = wr_t @ wqkv[0 * D:1 * D].T * SCALE
    wk_t = wr_t @ wqkv[1 * D:2 * D].T
    wv_t = wr_t @ wqkv[2 * D:3 * D].T
    weight_args = (g1.reshape(1, D), be1.reshape(1, D),
                   wq_t, wk_t, wv_t, wp.T, bp.reshape(1, D),
                   g2.reshape(1, D), be2.reshape(1, D),
                   w1.T, b1.reshape(1, HID), w2.T, b2.reshape(1, D),
                   jnp.asarray(_head_sum_matrix(D, HD)),
                   jnp.asarray(_chunk_partner_perms(RB, CS)))

    # advisory cost hint for the XLA scheduler
    mm_flops = (3 * 2 * R * D * D        # q, k, v (reduce folded in)
                + CS * 2 * R * D * D     # per-head segmented-sum scores
                + (CS - 1) * 2 * (2 * RB * RB * D) * NUM_ROW_BLOCKS   # partner perms (k and v)
                + 2 * R * D * D          # proj
                + 2 * R * D * HID + 2 * R * HID * D)                  # mlp
    ce = pl.CostEstimate(
        flops=int(mm_flops),
        transcendentals=int((CS + 1) * R * D + 2 * R),
        bytes_accessed=int(4 * (2 * R * D + sum(int(np.prod(w.shape)) for w in weight_args))),
    )

    full = lambda a: pl.BlockSpec(a.shape, lambda i, _n=a.ndim: (0,) * _n)
    out = pl.pallas_call(
        transblock_kernel,
        out_shape=jax.ShapeDtypeStruct((R, D), x.dtype),
        grid_spec=pltpu.PrefetchScalarGridSpec(
            num_scalar_prefetch=0,
            grid=(NUM_ROW_BLOCKS,),
            in_specs=[pl.BlockSpec((RB, D), lambda i: (i, 0))]
                     + [full(w) for w in weight_args],
            out_specs=pl.BlockSpec((RB, D), lambda i: (i, 0)),
        ),
        compiler_params=pltpu.CompilerParams(dimension_semantics=("parallel",)),
        cost_estimate=ce,
    )(x.reshape(R, D), *weight_args)
    return out.reshape(Bx, Nx, D)


# ---------------- pure-JAX reference (mirrors the PyTorch forward exactly) ----------------
def ref_forward(x, params):
    (g1, be1, wr, wqkv, wp, bp, g2, be2, w1, b1, w2, b2) = params

    def layernorm(x, g, b):
        mu = x.mean(-1, keepdims=True)
        var = ((x - mu) ** 2).mean(-1, keepdims=True)
        return (x - mu) / jnp.sqrt(var + EPS) * g + b

    xn = layernorm(x, g1, be1)
    h = xn @ wr.T
    qkv = (h @ wqkv.T).reshape(B, N, 3, H, HD).transpose(2, 0, 3, 1, 4)
    q, k, v = qkv[0], qkv[1], qkv[2]
    cs = math.ceil(N // 16)
    outs = []
    for c in range(N // cs):
        qc = q[:, :, c * cs:(c + 1) * cs]
        kc = k[:, :, c * cs:(c + 1) * cs]
        vc = v[:, :, c * cs:(c + 1) * cs]
        a = qc @ jnp.swapaxes(kc, -2, -1) * SCALE
        a = jax.nn.softmax(a, axis=-1)
        outs.append(jnp.swapaxes(a @ vc, 1, 2))
    att = jnp.concatenate(outs, axis=1).reshape(B, N, D)
    att = att @ wp.T + bp
    x1 = x + att
    xn2 = layernorm(x1, g2, be2)
    m = jnp.maximum(xn2 @ w1.T + b1, 0.0) @ w2.T + b2
    return x1 + m


if __name__ == "__main__":
    key = jax.random.PRNGKey(0)
    ks = jax.random.split(key, 12)

    # deterministic synthetic parameters (shapes per the module's __init__)
    g1  = jnp.ones((D,), jnp.float32)
    be1 = jnp.zeros((D,), jnp.float32)
    wr   = jax.random.normal(ks[0], (D, D), jnp.float32) * 0.05          # reduce (no bias)
    wqkv = jax.random.normal(ks[1], (3 * D, D), jnp.float32) * 0.05      # qkv   (no bias)
    wp   = jax.random.normal(ks[2], (D, D), jnp.float32) * 0.05          # proj
    bp   = jax.random.normal(ks[3], (D,), jnp.float32) * 0.01
    g2  = jnp.ones((D,), jnp.float32)
    be2 = jnp.zeros((D,), jnp.float32)
    w1 = jax.random.normal(ks[4], (HID, D), jnp.float32) * 0.05          # fc1
    b1 = jax.random.normal(ks[5], (HID,), jnp.float32) * 0.01
    w2 = jax.random.normal(ks[6], (D, HID), jnp.float32) * 0.05          # fc2
    b2 = jax.random.normal(ks[7], (D,), jnp.float32) * 0.01
    params = (g1, be1, wr, wqkv, wp, bp, g2, be2, w1, b1, w2, b2)

    x = jax.random.normal(ks[8], (B, N, D), jnp.float32)

    out = jax.block_until_ready(transblock(x, params))
    ref = jax.block_until_ready(ref_forward(x, params))

    np.testing.assert_allclose(np.asarray(out), np.asarray(ref), rtol=5e-4, atol=5e-4)
    print("KERNEL_OK")
</pallas_src>

<mosaic_0001>
module attributes {stable_mosaic.version = 11 : i64} {
  func.func @transblock_kernel(%arg0: i32, %arg1: memref<32x64xf32, #tpu.memory_space<vmem>>, %arg2: memref<1x64xf32, #tpu.memory_space<vmem>>, %arg3: memref<1x64xf32, #tpu.memory_space<vmem>>, %arg4: memref<64x64xf32, #tpu.memory_space<vmem>>, %arg5: memref<64x64xf32, #tpu.memory_space<vmem>>, %arg6: memref<64x64xf32, #tpu.memory_space<vmem>>, %arg7: memref<64x64xf32, #tpu.memory_space<vmem>>, %arg8: memref<1x64xf32, #tpu.memory_space<vmem>>, %arg9: memref<1x64xf32, #tpu.memory_space<vmem>>, %arg10: memref<1x64xf32, #tpu.memory_space<vmem>>, %arg11: memref<64x16xf32, #tpu.memory_space<vmem>>, %arg12: memref<1x16xf32, #tpu.memory_space<vmem>>, %arg13: memref<16x64xf32, #tpu.memory_space<vmem>>, %arg14: memref<1x64xf32, #tpu.memory_space<vmem>>, %arg15: memref<64x64xf32, #tpu.memory_space<vmem>>, %arg16: memref<1x32x32xf32, #tpu.memory_space<vmem>>, %arg17: memref<32x64xf32, #tpu.memory_space<vmem>>) attributes {dimension_semantics = [#tpu.dimension_semantics<parallel>], iteration_bounds = array<i64: 2>, scalar_prefetch = 0 : i64, scratch_operands = 0 : i64, tpu.core_type = #tpu.core_type<tc>, window_params = [{transform_indices = @transform_0, window_bounds = array<i64: 32, 64>}, {pipeline_mode = #tpu.pipeline_mode<synchronous>, transform_indices = @transform_1, window_bounds = array<i64: 1, 64>}, {pipeline_mode = #tpu.pipeline_mode<synchronous>, transform_indices = @transform_2, window_bounds = array<i64: 1, 64>}, {pipeline_mode = #tpu.pipeline_mode<synchronous>, transform_indices = @transform_3, window_bounds = array<i64: 64, 64>}, {pipeline_mode = #tpu.pipeline_mode<synchronous>, transform_indices = @transform_4, window_bounds = array<i64: 64, 64>}, {pipeline_mode = #tpu.pipeline_mode<synchronous>, transform_indices = @transform_5, window_bounds = array<i64: 64, 64>}, {pipeline_mode = #tpu.pipeline_mode<synchronous>, transform_indices = @transform_6, window_bounds = array<i64: 64, 64>}, {pipeline_mode = #tpu.pipeline_mode<synchronous>, transform_indices = @transform_7, window_bounds = array<i64: 1, 64>}, {pipeline_mode = #tpu.pipeline_mode<synchronous>, transform_indices = @transform_8, window_bounds = array<i64: 1, 64>}, {pipeline_mode = #tpu.pipeline_mode<synchronous>, transform_indices = @transform_9, window_bounds = array<i64: 1, 64>}, {pipeline_mode = #tpu.pipeline_mode<synchronous>, transform_indices = @transform_10, window_bounds = array<i64: 64, 16>}, {pipeline_mode = #tpu.pipeline_mode<synchronous>, transform_indices = @transform_11, window_bounds = array<i64: 1, 16>}, {pipeline_mode = #tpu.pipeline_mode<synchronous>, transform_indices = @transform_12, window_bounds = array<i64: 16, 64>}, {pipeline_mode = #tpu.pipeline_mode<synchronous>, transform_indices = @transform_13, window_bounds = array<i64: 1, 64>}, {pipeline_mode = #tpu.pipeline_mode<synchronous>, transform_indices = @transform_14, window_bounds = array<i64: 64, 64>}, {pipeline_mode = #tpu.pipeline_mode<synchronous>, transform_indices = @transform_15, window_bounds = array<i64: 1, 32, 32>}, {transform_indices = @transform_16, window_bounds = array<i64: 32, 64>}]} {
    %c0 = arith.constant 0 : index
    %c0_0 = arith.constant 0 : index
    %0 = vector.load %arg1[%c0, %c0_0] : memref<32x64xf32, #tpu.memory_space<vmem>>, vector<32x64xf32>
    %cst = arith.constant dense<0.000000e+00> : vector<32xf32>
    %1 = vector.multi_reduction <add>, %0, %cst [1] : vector<32x64xf32> to vector<32xf32>
    %2 = vector.shape_cast %1 : vector<32xf32> to vector<32x1xf32>
    %cst_1 = arith.constant 6.400000e+01 : f32
    %3 = vector.broadcast %cst_1 : f32 to vector<32x1xf32>
    %4 = arith.divf %2, %3 : vector<32x1xf32>
    %5 = vector.broadcast %4 : vector<32x1xf32> to vector<32x64xf32>
    %6 = arith.subf %0, %5 : vector<32x64xf32>
    %7 = arith.mulf %6, %6 : vector<32x64xf32>
    %cst_2 = arith.constant dense<0.000000e+00> : vector<32xf32>
    %8 = vector.multi_reduction <add>, %7, %cst_2 [1] : vector<32x64xf32> to vector<32xf32>
    %9 = vector.shape_cast %8 : vector<32xf32> to vector<32x1xf32>
    %cst_3 = arith.constant 6.400000e+01 : f32
    %10 = vector.broadcast %cst_3 : f32 to vector<32x1xf32>
    %11 = arith.divf %9, %10 : vector<32x1xf32>
    %cst_4 = arith.constant 9.99999974E-6 : f32
    %12 = vector.broadcast %cst_4 : f32 to vector<32x1xf32>
    %13 = arith.addf %11, %12 : vector<32x1xf32>
    %14 = math.rsqrt %13 : vector<32x1xf32>
    %15 = vector.broadcast %14 : vector<32x1xf32> to vector<32x64xf32>
    %16 = arith.mulf %6, %15 : vector<32x64xf32>
    %c0_5 = arith.constant 0 : index
    %c0_6 = arith.constant 0 : index
    %17 = vector.load %arg2[%c0_5, %c0_6] : memref<1x64xf32, #tpu.memory_space<vmem>>, vector<1x64xf32>
    %18 = vector.broadcast %17 : vector<1x64xf32> to vector<32x64xf32>
    %19 = arith.mulf %16, %18 : vector<32x64xf32>
    %c0_7 = arith.constant 0 : index
    %c0_8 = arith.constant 0 : index
    %20 = vector.load %arg3[%c0_7, %c0_8] : memref<1x64xf32, #tpu.memory_space<vmem>>, vector<1x64xf32>
    %21 = vector.broadcast %20 : vector<1x64xf32> to vector<32x64xf32>
    %22 = arith.addf %19, %21 : vector<32x64xf32>
    %c0_9 = arith.constant 0 : index
    %c0_10 = arith.constant 0 : index
    %23 = vector.load %arg4[%c0_9, %c0_10] : memref<64x64xf32, #tpu.memory_space<vmem>>, vector<64x64xf32>
    %cst_11 = arith.constant dense<0.000000e+00> : vector<32x64xf32>
    %24 = tpu.matmul %22, %23, %cst_11 {dimension_numbers = #tpu.dot_dimension_numbers<[1], [0], [0], [1], [0, 0, 1, 1], [], []>} : vector<32x64xf32>, vector<64x64xf32>, vector<32x64xf32> -> vector<32x64xf32>
    %c0_12 = arith.constant 0 : index
    %c0_13 = arith.constant 0 : index
    %25 = vector.load %arg5[%c0_12, %c0_13] : memref<64x64xf32, #tpu.memory_space<vmem>>, vector<64x64xf32>
    %cst_14 = arith.constant dense<0.000000e+00> : vector<32x64xf32>
    %26 = tpu.matmul %22, %25, %cst_14 {dimension_numbers = #tpu.dot_dimension_numbers<[1], [0], [0], [1], [0, 0, 1, 1], [], []>} : vector<32x64xf32>, vector<64x64xf32>, vector<32x64xf32> -> vector<32x64xf32>
    %c0_15 = arith.constant 0 : index
    %c0_16 = arith.constant 0 : index
    %27 = vector.load %arg6[%c0_15, %c0_16] : memref<64x64xf32, #tpu.memory_space<vmem>>, vector<64x64xf32>
    %cst_17 = arith.constant dense<0.000000e+00> : vector<32x64xf32>
    %28 = tpu.matmul %22, %27, %cst_17 {dimension_numbers = #tpu.dot_dimension_numbers<[1], [0], [0], [1], [0, 0, 1, 1], [], []>} : vector<32x64xf32>, vector<64x64xf32>, vector<32x64xf32> -> vector<32x64xf32>
    %c0_18 = arith.constant 0 : index
    %c0_19 = arith.constant 0 : index
    %29 = vector.load %arg15[%c0_18, %c0_19] : memref<64x64xf32, #tpu.memory_space<vmem>>, vector<64x64xf32>
    %30 = arith.mulf %24, %26 : vector<32x64xf32>
    %cst_20 = arith.constant dense<0.000000e+00> : vector<32x64xf32>
    %31 = tpu.matmul %30, %29, %cst_20 {dimension_numbers = #tpu.dot_dimension_numbers<[1], [0], [0], [1], [0, 0, 1, 1], [], []>} : vector<32x64xf32>, vector<64x64xf32>, vector<32x64xf32> -> vector<32x64xf32>
    %c0_21 = arith.constant 0 : index
    %c0_22 = arith.constant 0 : index
    %c0_23 = arith.constant 0 : index
    %32 = vector.load %arg16[%c0_21, %c0_22, %c0_23] : memref<1x32x32xf32, #tpu.memory_space<vmem>>, vector<1x32x32xf32>
    %33 = vector.shape_cast %32 : vector<1x32x32xf32> to vector<32x32xf32>
    %cst_24 = arith.constant dense<0.000000e+00> : vector<32x64xf32>
    %34 = tpu.matmul %33, %26, %cst_24 {dimension_numbers = #tpu.dot_dimension_numbers<[1], [0], [0], [1], [0, 0, 1, 1], [], []>} : vector<32x32xf32>, vector<32x64xf32>, vector<32x64xf32> -> vector<32x64xf32>
    %cst_25 = arith.constant dense<0.000000e+00> : vector<32x64xf32>
    %35 = tpu.matmul %33, %28, %cst_25 {dimension_numbers = #tpu.dot_dimension_numbers<[1], [0], [0], [1], [0, 0, 1, 1], [], []>} : vector<32x32xf32>, vector<32x64xf32>, vector<32x64xf32> -> vector<32x64xf32>
    %36 = arith.mulf %24, %34 : vector<32x64xf32>
    %cst_26 = arith.constant dense<0.000000e+00> : vector<32x64xf32>
    %37 = tpu.matmul %36, %29, %cst_26 {dimension_numbers = #tpu.dot_dimension_numbers<[1], [0], [0], [1], [0, 0, 1, 1], [], []>} : vector<32x64xf32>, vector<64x64xf32>, vector<32x64xf32> -> vector<32x64xf32>
    %38 = arith.maximumf %31, %37 : vector<32x64xf32>
    %39 = arith.subf %31, %38 : vector<32x64xf32>
    %40 = math.exp %39 : vector<32x64xf32>
    %41 = arith.subf %37, %38 : vector<32x64xf32>
    %42 = math.exp %41 : vector<32x64xf32>
    %43 = arith.addf %40, %42 : vector<32x64xf32>
    %44 = arith.mulf %40, %28 : vector<32x64xf32>
    %45 = arith.mulf %42, %35 : vector<32x64xf32>
    %46 = arith.addf %44, %45 : vector<32x64xf32>
    %47 = tpu.reciprocal %43 {approx = true} : vector<32x64xf32> -> vector<32x64xf32>
    %48 = arith.mulf %46, %47 : vector<32x64xf32>
    %c0_27 = arith.constant 0 : index
    %c0_28 = arith.constant 0 : index
    %49 = vector.load %arg7[%c0_27, %c0_28] : memref<64x64xf32, #tpu.memory_space<vmem>>, vector<64x64xf32>
    %cst_29 = arith.constant dense<0.000000e+00> : vector<32x64xf32>
    %50 = tpu.matmul %48, %49, %cst_29 {dimension_numbers = #tpu.dot_dimension_numbers<[1], [0], [0], [1], [0, 0, 1, 1], [], []>} : vector<32x64xf32>, vector<64x64xf32>, vector<32x64xf32> -> vector<32x64xf32>
    %c0_30 = arith.constant 0 : index
    %c0_31 = arith.constant 0 : index
    %51 = vector.load %arg8[%c0_30, %c0_31] : memref<1x64xf32, #tpu.memory_space<vmem>>, vector<1x64xf32>
    %52 = vector.broadcast %51 : vector<1x64xf32> to vector<32x64xf32>
    %53 = arith.addf %50, %52 : vector<32x64xf32>
    %54 = arith.addf %0, %53 : vector<32x64xf32>
    %cst_32 = arith.constant dense<0.000000e+00> : vector<32xf32>
    %55 = vector.multi_reduction <add>, %54, %cst_32 [1] : vector<32x64xf32> to vector<32xf32>
    %56 = vector.shape_cast %55 : vector<32xf32> to vector<32x1xf32>
    %cst_33 = arith.constant 6.400000e+01 : f32
    %57 = vector.broadcast %cst_33 : f32 to vector<32x1xf32>
    %58 = arith.divf %56, %57 : vector<32x1xf32>
    %59 = vector.broadcast %58 : vector<32x1xf32> to vector<32x64xf32>
    %60 = arith.subf %54, %59 : vector<32x64xf32>
    %61 = arith.mulf %60, %60 : vector<32x64xf32>
    %cst_34 = arith.constant dense<0.000000e+00> : vector<32xf32>
    %62 = vector.multi_reduction <add>, %61, %cst_34 [1] : vector<32x64xf32> to vector<32xf32>
    %63 = vector.shape_cast %62 : vector<32xf32> to vector<32x1xf32>
    %cst_35 = arith.constant 6.400000e+01 : f32
    %64 = vector.broadcast %cst_35 : f32 to vector<32x1xf32>
    %65 = arith.divf %63, %64 : vector<32x1xf32>
    %cst_36 = arith.constant 9.99999974E-6 : f32
    %66 = vector.broadcast %cst_36 : f32 to vector<32x1xf32>
    %67 = arith.addf %65, %66 : vector<32x1xf32>
    %68 = math.rsqrt %67 : vector<32x1xf32>
    %69 = vector.broadcast %68 : vector<32x1xf32> to vector<32x64xf32>
    %70 = arith.mulf %60, %69 : vector<32x64xf32>
    %c0_37 = arith.constant 0 : index
    %c0_38 = arith.constant 0 : index
    %71 = vector.load %arg9[%c0_37, %c0_38] : memref<1x64xf32, #tpu.memory_space<vmem>>, vector<1x64xf32>
    %72 = vector.broadcast %71 : vector<1x64xf32> to vector<32x64xf32>
    %73 = arith.mulf %70, %72 : vector<32x64xf32>
    %c0_39 = arith.constant 0 : index
    %c0_40 = arith.constant 0 : index
    %74 = vector.load %arg10[%c0_39, %c0_40] : memref<1x64xf32, #tpu.memory_space<vmem>>, vector<1x64xf32>
    %75 = vector.broadcast %74 : vector<1x64xf32> to vector<32x64xf32>
    %76 = arith.addf %73, %75 : vector<32x64xf32>
    %c0_41 = arith.constant 0 : index
    %c0_42 = arith.constant 0 : index
    %77 = vector.load %arg11[%c0_41, %c0_42] : memref<64x16xf32, #tpu.memory_space<vmem>>, vector<64x16xf32>
    %cst_43 = arith.constant dense<0.000000e+00> : vector<32x16xf32>
    %78 = tpu.matmul %76, %77, %cst_43 {dimension_numbers = #tpu.dot_dimension_numbers<[1], [0], [0], [1], [0, 0, 1, 1], [], []>} : vector<32x64xf32>, vector<64x16xf32>, vector<32x16xf32> -> vector<32x16xf32>
    %c0_44 = arith.constant 0 : index
    %c0_45 = arith.constant 0 : index
    %79 = vector.load %arg12[%c0_44, %c0_45] : memref<1x16xf32, #tpu.memory_space<vmem>>, vector<1x16xf32>
    %80 = vector.broadcast %79 : vector<1x16xf32> to vector<32x16xf32>
    %81 = arith.addf %78, %80 : vector<32x16xf32>
    %cst_46 = arith.constant 0.000000e+00 : f32
    %82 = vector.broadcast %cst_46 : f32 to vector<32x16xf32>
    %83 = arith.maximumf %81, %82 : vector<32x16xf32>
    %c0_47 = arith.constant 0 : index
    %c0_48 = arith.constant 0 : index
    %84 = vector.load %arg13[%c0_47, %c0_48] : memref<16x64xf32, #tpu.memory_space<vmem>>, vector<16x64xf32>
    %cst_49 = arith.constant dense<0.000000e+00> : vector<32x64xf32>
    %85 = tpu.matmul %83, %84, %cst_49 {dimension_numbers = #tpu.dot_dimension_numbers<[1], [0], [0], [1], [0, 0, 1, 1], [], []>} : vector<32x16xf32>, vector<16x64xf32>, vector<32x64xf32> -> vector<32x64xf32>
    %c0_50 = arith.constant 0 : index
    %c0_51 = arith.constant 0 : index
    %86 = vector.load %arg14[%c0_50, %c0_51] : memref<1x64xf32, #tpu.memory_space<vmem>>, vector<1x64xf32>
    %87 = vector.broadcast %86 : vector<1x64xf32> to vector<32x64xf32>
    %88 = arith.addf %85, %87 : vector<32x64xf32>
    %89 = arith.addf %54, %88 : vector<32x64xf32>
    %c0_52 = arith.constant 0 : index
    %c0_53 = arith.constant 0 : index
    %90 = vector.load %arg17[%c0_52, %c0_53] : memref<32x64xf32, #tpu.memory_space<vmem>>, vector<32x64xf32>
    tpu.vector_store %arg17[%c0_52, %c0_53], %89 {strides = array<i32>} : memref<32x64xf32, #tpu.memory_space<vmem>>, vector<32x64xf32>,
    return
  }
  func.func @transform_0(%arg0: i32) -> (i32, i32) {
    %c0_i32 = arith.constant 0 : i32
    %c0_i32_0 = arith.constant 0 : i32
    return %arg0, %c0_i32 : i32, i32
  }
  func.func @transform_1(%arg0: i32) -> (i32, i32) {
    %c0_i32 = arith.constant 0 : i32
    %c0_i32_0 = arith.constant 0 : i32
    %c0_i32_1 = arith.constant 0 : i32
    return %c0_i32, %c0_i32_0 : i32, i32
  }
  func.func @transform_2(%arg0: i32) -> (i32, i32) {
    %c0_i32 = arith.constant 0 : i32
    %c0_i32_0 = arith.constant 0 : i32
    %c0_i32_1 = arith.constant 0 : i32
    return %c0_i32, %c0_i32_0 : i32, i32
  }
  func.func @transform_3(%arg0: i32) -> (i32, i32) {
    %c0_i32 = arith.constant 0 : i32
    %c0_i32_0 = arith.constant 0 : i32
    %c0_i32_1 = arith.constant 0 : i32
    return %c0_i32, %c0_i32_0 : i32, i32
  }
  func.func @transform_4(%arg0: i32) -> (i32, i32) {
    %c0_i32 = arith.constant 0 : i32
    %c0_i32_0 = arith.constant 0 : i32
    %c0_i32_1 = arith.constant 0 : i32
    return %c0_i32, %c0_i32_0 : i32, i32
  }
  func.func @transform_5(%arg0: i32) -> (i32, i32) {
    %c0_i32 = arith.constant 0 : i32
    %c0_i32_0 = arith.constant 0 : i32
    %c0_i32_1 = arith.constant 0 : i32
    return %c0_i32, %c0_i32_0 : i32, i32
  }
  func.func @transform_6(%arg0: i32) -> (i32, i32) {
    %c0_i32 = arith.constant 0 : i32
    %c0_i32_0 = arith.constant 0 : i32
    %c0_i32_1 = arith.constant 0 : i32
    return %c0_i32, %c0_i32_0 : i32, i32
  }
  func.func @transform_7(%arg0: i32) -> (i32, i32) {
    %c0_i32 = arith.constant 0 : i32
    %c0_i32_0 = arith.constant 0 : i32
    %c0_i32_1 = arith.constant 0 : i32
    return %c0_i32, %c0_i32_0 : i32, i32
  }
  func.func @transform_8(%arg0: i32) -> (i32, i32) {
    %c0_i32 = arith.constant 0 : i32
    %c0_i32_0 = arith.constant 0 : i32
    %c0_i32_1 = arith.constant 0 : i32
    return %c0_i32, %c0_i32_0 : i32, i32
  }
  func.func @transform_9(%arg0: i32) -> (i32, i32) {
    %c0_i32 = arith.constant 0 : i32
    %c0_i32_0 = arith.constant 0 : i32
    %c0_i32_1 = arith.constant 0 : i32
    return %c0_i32, %c0_i32_0 : i32, i32
  }
  func.func @transform_10(%arg0: i32) -> (i32, i32) {
    %c0_i32 = arith.constant 0 : i32
    %c0_i32_0 = arith.constant 0 : i32
    %c0_i32_1 = arith.constant 0 : i32
    return %c0_i32, %c0_i32_0 : i32, i32
  }
  func.func @transform_11(%arg0: i32) -> (i32, i32) {
    %c0_i32 = arith.constant 0 : i32
    %c0_i32_0 = arith.constant 0 : i32
    %c0_i32_1 = arith.constant 0 : i32
    return %c0_i32, %c0_i32_0 : i32, i32
  }
  func.func @transform_12(%arg0: i32) -> (i32, i32) {
    %c0_i32 = arith.constant 0 : i32
    %c0_i32_0 = arith.constant 0 : i32
    %c0_i32_1 = arith.constant 0 : i32
    return %c0_i32, %c0_i32_0 : i32, i32
  }
  func.func @transform_13(%arg0: i32) -> (i32, i32) {
    %c0_i32 = arith.constant 0 : i32
    %c0_i32_0 = arith.constant 0 : i32
    %c0_i32_1 = arith.constant 0 : i32
    return %c0_i32, %c0_i32_0 : i32, i32
  }
  func.func @transform_14(%arg0: i32) -> (i32, i32) {
    %c0_i32 = arith.constant 0 : i32
    %c0_i32_0 = arith.constant 0 : i32
    %c0_i32_1 = arith.constant 0 : i32
    return %c0_i32, %c0_i32_0 : i32, i32
  }
  func.func @transform_15(%arg0: i32) -> (i32, i32, i32) {
    %c0_i32 = arith.constant 0 : i32
    %c0_i32_0 = arith.constant 0 : i32
    %c0_i32_1 = arith.constant 0 : i32
    %c0_i32_2 = arith.constant 0 : i32
    return %c0_i32, %c0_i32_0, %c0_i32_1 : i32, i32, i32
  }
  func.func @transform_16(%arg0: i32) -> (i32, i32) {
    %c0_i32 = arith.constant 0 : i32
    %c0_i32_0 = arith.constant 0 : i32
    return %arg0, %c0_i32 : i32, i32
  }
}

</mosaic_0001>

<bundles_post_ra>
// kernel: tpu_custom_call.1
= control target key start
LH: loop header
LB: loop body
LE: loop exit
PB: predicated region body
PF: predicated region fallthrough
CT: control target
= control target key end

     0   :  { %s2542_s0 = inlined_call_operand.vmem [shape: f32[64,64], index: 0, kind: input, shape index: {}]   ;;  %s2543_s1 = inlined_call_operand.hbm [shape: f32[1,64], index: 1, kind: input, shape index: {}]   ;;  %s2544_s2 = inlined_call_operand.vmem [shape: f32[1,64], index: 2, kind: input, shape index: {}]   ;;  %s2545_s3 = inlined_call_operand.hbm [shape: f32[64,64], index: 3, kind: input, shape index: {}]   ;;  %s2546_s4 = inlined_call_operand.hbm [shape: f32[64,64], index: 4, kind: input, shape index: {}]   ;;  %s2547_s5 = inlined_call_operand.hbm [shape: f32[64,64], index: 5, kind: input, shape index: {}]   ;;  %s2548_s6 = inlined_call_operand.hbm [shape: f32[64,64], index: 6, kind: input, shape index: {}]   ;;  %s2549_s7 = inlined_call_operand.vmem [shape: f32[1,64], index: 7, kind: input, shape index: {}]   ;;  %s2550_s8 = inlined_call_operand.vmem [shape: f32[1,64], index: 8, kind: input, shape index: {}]   ;;  %s2551_s9 = inlined_call_operand.vmem [shape: f32[1,64], index: 9, kind: input, shape index: {}]   ;;  %s2552_s10 = inlined_call_operand.vmem [shape: f32[64,16], index: 10, kind: input, shape index: {}]   ;;  %s2553_s11 = inlined_call_operand.vmem [shape: f32[1,16], index: 11, kind: input, shape index: {}]   ;;  %s2554_s12 = inlined_call_operand.vmem [shape: f32[16,64], index: 12, kind: input, shape index: {}]   ;;  %s2555_s13 = inlined_call_operand.vmem [shape: f32[1,64], index: 13, kind: input, shape index: {}]   ;;  %s2556_s14 = inlined_call_operand.hbm [shape: f32[64,64], index: 14, kind: input, shape index: {}]   ;;  %s2557_s15 = inlined_call_operand.hbm [shape: f32[1,32,32], index: 15, kind: input, shape index: {}]   ;;  %s2558_s16 = inlined_call_operand.hbm [shape: f32[64,64], index: 16, kind: output, shape index: {}]  }
   0x1   :  { %2568 = sst [smem:[#allocation27_spill]] %s2542_s0 }
   0x2   :  { %2569 = sst [smem:[#allocation28_spill]] %s2543_s1 }
   0x3   :  { %2570 = sst [smem:[#allocation29_spill]] %s2545_s3 }
   0x4   :  { %2571 = sst [smem:[#allocation30_spill]] %s2547_s5 }
   0x5   :  { %2572 = sst [smem:[#allocation31_spill]] %s2558_s16 }
   0x6   :  { %21 = vsyncpa [#allocation3], 0 }
   0x7   :  { %22 = vsyncpa [#allocation6], 0 }
   0x8   :  { %23 = vsyncpa [#allocation9], 0 }
   0x9   :  { %24 = vsyncpa [#allocation12], 0 }
   0xa   :  { %25 = vsyncpa [#allocation4], 0 }
   0xb   :  { %27 = vsyncpa [#allocation4 + $0x1], 0  ;;  %s2156_s21 = smov 0   ;;  %s2158_s22 = smov 0  }
   0xc   :  { %s2160_s23 = smov 0   ;;  %s2162_s24 = smov 0  }
   0xd LB: > { %2573 = sst [smem:[#allocation20_spill]] %s2045_s21  ;;  %s2177_s25 = sadd.s32 4294967295, %s2057_s24   ;;  %s2057_s24 = sphi %s2162_s24, %s2593_s24   ;;  %s2053_s23 = sphi %s2160_s23, %s2595_s23   ;;  %s2049_s22 = sphi %s2158_s22, %s2597_s22   ;;  %s2045_s21 = sphi %s2156_s21, %s2596_s21  }
   0xe   : > { %2574 = sst [smem:[#allocation21_spill]] %s2053_s23  ;;  %s1522_s26 = sadd.s32 4294967294, %s2057_s24  }
   0xf   : > { %2575 = sst [smem:[#allocation22_spill]] %s2057_s24  ;;  %s2181_s27 = sadd.s32 1, %s2057_s24  }
  0x10   : > { %2576 = sst [smem:[#allocation23_spill]] %s2181_s27  ;;  %s381_s28 = sadd.s32 1, %s2053_s23 }
  0x11   : > { %s378_s29 = ssub.s32 %s2057_s24, %s2181_s27  ;;  %p391_p0 = scmp.ne.s32.totalorder %s2053_s23, %s2049_s22 }
  0x12   : > { %p379_p1 = scmp.eq.s32.totalorder %s378_s29, 0  ;;  %p392_p2 = scmp.eq.s32.totalorder %s2177_s25, 1 }
  0x13   : > { %p397_p3 = scmp.ne.s32.totalorder %s2049_s22, %s2045_s21  ;;  %p398_p4 = scmp.eq.s32.totalorder %s1522_s26, 1 }
  0x14   : > { %s2192_s30 = scalar_select %p379_p1, %s2053_s23, %s381_s28  }
  0x15   : > { %p2194_p5 = por %p392_p2, %p391_p0  ;;  %p2198_p6 = por %p398_p4, %p397_p3 }
  0x16   : > { %2577 = sst [smem:[#allocation24_spill]] %s2192_s30  ;;  %p1523_p7 = scmp.ge.s32.totalorder %s2057_s24, 1 }
  0x17   : > { %s2578_s0 = scalar_select %p2194_p5, 1, 0 }
  0x18   : > { %s2580_s17 = scalar_select %p2198_p6, 1, 0 }
  0x19   : > { %2579 = sst [smem:[#allocation25_spill]] %s2578_s0  ;;  %p405_p8 = scmp.lt.s32.totalorder %s2057_s24, 3 }
  0x1a   : > { %2581 = sst [smem:[#allocation26_spill]] %s2580_s17  ;;  %p1661_p9 = scmp.eq.s32.totalorder %s2177_s25, 0 }
  0x1b   : > { %p2205_p10 = pnand %p1523_p7, %p405_p8  ;;  %s2583_s3 = sld [smem:[#allocation29_spill]] }
  0x1c   : > { %s2059_s28 = smov [#allocation5]   ;;  %s2585_s5 = sld [smem:[#allocation30_spill]] }
  0x1d   : > { %p1635_p11 = pneg %p2205_p10  ;;  %s433_s29 = sshll.u32 %s2059_s28, 4  ;;  %s434_s29 = int_to_ptr.vmem [resolvable:$true] %s433_s29 }
  0x1e   : > { %s2060_s19 = smov 128   ;;  %s2061_s20 = smov 8  }
  0x1f   : > { %p2216_p12 = pnand %p1661_p9, %p1635_p11  ;;  %s2062_s28 = smov [#allocation8]  }
  0x20   : > { %s508_s0 = sshll.u32 %s2556_s14, 4  ;;  %s2586_s1 = sld [smem:[#allocation28_spill]]  ;;  %s509_s0 = int_to_ptr.hbm [resolvable:$true] %s508_s0 }
  0x21   : > { %s431_s26 = sshll.u32 %s2583_s3, 4  ;;  %s461_s3 = sshll.u32 %s2062_s28, 4  ;;  %s432_s26 = int_to_ptr.hbm [resolvable:$true] %s431_s26  ;;  %s462_s3 = int_to_ptr.vmem [resolvable:$true] %s461_s3 }
  0x22   : > { %s459_s17 = sshll.u32 %s2585_s5, 4  ;;  %s2063_s16 = smov [#allocation11]   ;;  %s460_s17 = int_to_ptr.hbm [resolvable:$true] %s459_s17 }
  0x23   : > { %1641 = dma.hbm_to_vmem [thread:$0]  (!%p2216_p12), %s432_s26, 1024, %s434_s29, [#allocation6], %s2060_s19, %s2060_s19, %s2061_s20  }
  0x24   : > { %1647 = dma.hbm_to_vmem [thread:$0]  (!%p2216_p12), %s460_s17, 1024, %s462_s3, [#allocation9], %s2060_s19, %s2060_s19, %s2061_s20  }
  0x25   : > { %s510_s26 = sshll.u32 %s2063_s16, 4  ;;  %s2064_s21 = smov [#allocation2]   ;;  %s511_s26 = int_to_ptr.vmem [resolvable:$true] %s510_s26 }
  0x26   : > { %s417_s5 = sshll.u32 %s2586_s1, 4  ;;  %s419_s24 = sshll.u32 %s2064_s21, 4  ;;  %s418_s5 = int_to_ptr.hbm [resolvable:$true] %s417_s5  ;;  %s420_s24 = int_to_ptr.vmem [resolvable:$true] %s419_s24 }
  0x27   : > { %1653 = dma.hbm_to_vmem [thread:$0]  (!%p2216_p12), %s509_s0, 1024, %s511_s26, [#allocation12], %s2060_s19, %s2060_s19, %s2061_s20  }
  0x28   : > { %s445_s3 = sshll.u32 %s2546_s4, 4  ;;  %s473_s23 = sshll.u32 %s2548_s6, 4  ;;  %s446_s3 = int_to_ptr.hbm [resolvable:$true] %s445_s3  ;;  %s474_s23 = int_to_ptr.hbm [resolvable:$true] %s473_s23 }
  0x29   : > { %1638 = dma.hbm_to_vmem [thread:$0]  (!%p2216_p12), %s418_s5, 16, %s420_s24, [#allocation3]  }
  0x2a   : > { %s2065_s27 = smov [#allocation7]   ;;  %s2066_s0 = smov [#allocation10]  }
  0x2b   : > { %s447_s1 = sshll.u32 %s2065_s27, 4  ;;  %s475_s26 = sshll.u32 %s2066_s0, 4  ;;  %s448_s1 = int_to_ptr.vmem [resolvable:$true] %s447_s1  ;;  %s476_s26 = int_to_ptr.vmem [resolvable:$true] %s475_s26 }
  0x2c   : > { %1644 = dma.hbm_to_vmem [thread:$0]  (!%p2216_p12), %s446_s3, 1024, %s448_s1, [#allocation6], %s2060_s19, %s2060_s19, %s2061_s20  }
  0x2d   : > { %s522_s5 = sshll.u32 %s2557_s15, 4  ;;  %s2067_s24 = smov [#allocation13]   ;;  %s523_s5 = int_to_ptr.hbm [resolvable:$true] %s522_s5 }
  0x2e   : > { %1650 = dma.hbm_to_vmem [thread:$0]  (!%p2216_p12), %s474_s23, 1024, %s476_s26, [#allocation9], %s2060_s19, %s2060_s19, %s2061_s20  }
  0x2f   : > { %s524_s28 = sshll.u32 %s2067_s24, 4  ;;  %549 = sbr.rel (%p2205_p10) target bundleno = 1459 (0x5b3), region = 84  ;;  %s525_s28 = int_to_ptr.vmem [resolvable:$true] %s524_s28 }
  0x30   : > { %1656 = dma.hbm_to_vmem [thread:$0]  (!%p2216_p12), %s523_s5, 512, %s525_s28, [#allocation12], %s2060_s19, %s2060_s19, %s2061_s20  }
  0x34   : > { %2024 = dma.done.wait (%p1661_p9), [#allocation3], 16  }
  0x35   : > { %2026 = vsyncadd (%p1661_p9), [#allocation3], 4294967280 }
  0x36   : > { %2028 = dma.done.wait (%p1661_p9), [#allocation6], 2048  }
  0x37   : > { %2030 = vsyncadd (%p1661_p9), [#allocation6], 4294965248 }
  0x38   : > { %2032 = dma.done.wait (%p1661_p9), [#allocation9], 2048  }
  0x39   : > { %2034 = vsyncadd (%p1661_p9), [#allocation9], 4294965248 }
  0x3a   : > { %2036 = dma.done.wait (%p1661_p9), [#allocation12], 1536  }
  0x3b   : > { %2038 = vsyncadd (%p1661_p9), [#allocation12], 4294965760  ;;  %s1541_s1 = sshll.u32 %s2177_s25, 2  ;;  %vm641_vm0 = vcmask 523264   ;;  %s2587_s20 = sld [smem:[#allocation27_spill]]  ;;  %v2068_v8 = vmov 64.0  }
  0x3c   : > { %p631_p13 = scmp.lt.s32.totalorder %s1541_s1, 7  ;;  %1727 = vrcp.f32 %v2068_v8  ;;  %v760_v35 = vld [vmem:[#allocation5 + $0x38] sm:$0xff]  ;;  %v759_v37 = vld [vmem:[#allocation5 + $0x30] sm:$0xff]  ;;  %v758_v39 = vld [vmem:[#allocation5 + $0x28] sm:$0xff]  ;;  %vm933_vm14 = vcmask 261120   ;;  %s627_s18 = sand.u32 1, %s2049_s22  }
  0x3d   : > { %v809_v36 = vld [vmem:[#allocation7 + $0x38] sm:$0xff]  ;;  %781 = vmatpush.msra.mxu0 %v760_v35  ;;  %1589 = vmatpush.msra.mxu2 %v760_v35  ;;  %v808_v38 = vld [vmem:[#allocation7 + $0x30] sm:$0xff]  ;;  %v807_v40 = vld [vmem:[#allocation7 + $0x28] sm:$0xff]  ;;  %s1588_s16 = sshll.u32 %s2177_s25, 5  ;;  %s2588_s0 = sld [smem:[#allocation31_spill]] }
  0x3e   : > { %s2599_s1 = smov (!%p631_p13, %s1541_s1), 7  ;;  %818 = vmatpush.msra.mxu1 %v809_v36  ;;  %1597 = vmatpush.msra.mxu3 %v809_v36  ;;  %v757_v41 = vld [vmem:[#allocation5 + $0x20] sm:$0xff]  ;;  %v756_v43 = vld [vmem:[#allocation5 + $0x18] sm:$0xff]  ;;  %v755_v45 = vld [vmem:[#allocation5 + $0x10] sm:$0xff]  ;;  %s1376_s25 = scalar_lea.sflag [#allocation4], %s627_s18 }
  0x3f   : > { %s1542_s30 = sshll.u32 %s2599_s1, 3  ;;  %782 = vmatpush.msra.mxu0 %v759_v37  ;;  %1590 = vmatpush.msra.mxu2 %v759_v37  ;;  %v806_v42 = vld [vmem:[#allocation7 + $0x20] sm:$0xff]  ;;  %v805_v44 = vld [vmem:[#allocation7 + $0x18] sm:$0xff]  ;;  %v804_v46 = vld [vmem:[#allocation7 + $0x10] sm:$0xff] }
  0x40   : > { %819 = vmatpush.msra.mxu1 %v808_v38  ;;  %1598 = vmatpush.msra.mxu3 %v808_v38  ;;  %v754_v47 = vld [vmem:[#allocation5 + $0x8] sm:$0xff]  ;;  %v753_v49 = vld [vmem:[#allocation5] sm:$0xff]  ;;  %v846_v51 = vld [vmem:[#allocation8 + $0x38] sm:$0xff] }
  0x41   : > { %s634_s3 = scalar_lea.vmem %s2587_s20, %s1542_s30  ;;  %783 = vmatpush.msra.mxu0 %v758_v39  ;;  %1591 = vmatpush.msra.mxu2 %v758_v39  ;;  %v803_v48 = vld [vmem:[#allocation7 + $0x8] sm:$0xff]  ;;  %v802_v50 = vld [vmem:[#allocation7] sm:$0xff]  ;;  %v845_v52 = vld [vmem:[#allocation8 + $0x30] sm:$0xff] }
  0x42   : > { %v2292_v0 = vld [vmem:[%s634_s3 + $0x10] sm:$0xff]  ;;  %v2294_v1 = vld [vmem:[%s634_s3] sm:$0xff]  ;;  %v2300_v4 = vld [vmem:[%s634_s3 + $0x18] sm:$0xff]  ;;  %v1728_v9 = vpop.eup %1727  ;;  %820 = vmatpush.msra.mxu1 %v807_v40  ;;  %1599 = vmatpush.msra.mxu3 %v807_v40 }
  0x43   : > { %v648_v2 = vsel %vm641_vm0, %v2292_v0, 0.0  ;;  %v642_v3 = vsel %vm641_vm0, %v2294_v1, 0.0  ;;  %v2302_v5 = vld [vmem:[%s634_s3 + $0x8] sm:$0xff]  ;;  %v651_v6 = vsel %vm641_vm0, %v2300_v4, 0.0  ;;  %v655_v10 = vmul.f32 64.0, %v1728_v9  ;;  %784 = vmatpush.msra.mxu0 %v757_v41  ;;  %1592 = vmatpush.msra.mxu2 %v757_v41  ;;  %v842_v61 = vld [vmem:[#allocation8 + $0x18] sm:$0xff]  ;;  %s1387_s21 = scalar_lea.hbm %s2588_s0, %s1588_s16 }
  0x44   : > { %649 = vadd.xlane.f32.xlu0 %v648_v2  ;;  %643 = vadd.xlane.f32.xlu1 %v642_v3  ;;  %v645_v7 = vsel %vm641_vm0, %v2302_v5, 0.0  ;;  %vm659_vm1 = vweird.f32 %v1728_v9  ;;  %v844_v55 = vld [vmem:[#allocation8 + $0x28] sm:$0xff]  ;;  %v843_v58 = vld [vmem:[#allocation8 + $0x20] sm:$0xff]  ;;  %v841_v62 = vld [vmem:[#allocation8 + $0x10] sm:$0xff]  ;;  %s1540_s3 = sshll.u32 %s627_s18, 5  ;;  %s1390_s5 = sshll.u32 %s1387_s21, 4  ;;  %s1391_s5 = int_to_ptr.hbm [resolvable:$true] %s1390_s5 }
  0x45   : > { %v656_v11 = vsub.f32 1.0, %v655_v10  ;;  %821 = vmatpush.msra.mxu1 %v806_v42  ;;  %1600 = vmatpush.msra.mxu3 %v806_v42  ;;  %v840_v3 = vld [vmem:[#allocation8 + $0x8] sm:$0xff]  ;;  %v839_v8 = vld [vmem:[#allocation8] sm:$0xff]  ;;  %v1721_v37 = vld [vmem:[%s2544_s2] ss:$0 sm:$0xff]  ;;  %s629_s17 = scalar_lea.vmem [#allocation14], %s1540_s3 }
  0x46   : > { %785 = vmatpush.msra.mxu0 %v756_v43  ;;  %1593 = vmatpush.msra.mxu2 %v756_v43  ;;  %s1388_s29 = sshll.u32 %s629_s17, 4  ;;  %s1993_s24 = sshra.s32 %s1391_s5, 4  ;;  %s1389_s29 = int_to_ptr.vmem [resolvable:$true] %s1388_s29  ;;  %s1994_s24 = int_to_ptr.hbm [resolvable:$true] %s1993_s24 }
  0x47   : > { %v657_v12 = vmul.f32 %v1728_v9, %v656_v11  ;;  %822 = vmatpush.msra.mxu1 %v805_v44  ;;  %1601 = vmatpush.msra.mxu3 %v805_v44  ;;  %s1995_s28 = scalar_lea.hbm %s1994_s24, 32  ;;  %s1999_s19 = scalar_lea.hbm %s2588_s0, 64 }
  0x48   : > { %786 = vmatpush.msra.mxu0 %v755_v45  ;;  %1594 = vmatpush.msra.mxu2 %v755_v45  ;;  %p1996_p0 = scmp.ne.s32.totalorder %s1994_s24, %s1995_s28  ;;  %p2000_p3 = scmp.lt.s32.totalorder %s1994_s24, %s2588_s0 }
  0x49   : > { %v658_v13 = vadd.f32 %v1728_v9, %v657_v12  ;;  %823 = vmatpush.msra.mxu1 %v804_v46  ;;  %1602 = vmatpush.msra.mxu3 %v804_v46  ;;  %p2001_p4 = scmp.lt.s32.totalorder %s1999_s19, %s1995_s28 }
  0x4a   : > { %787 = vmatpush.msra.mxu0 %v754_v47  ;;  %1595 = vmatpush.msra.mxu2 %v754_v47  ;;  %p1997_p1 = pnand %p1996_p0, %p2194_p5 }
  0x4b   : > { %v2308_v14 = vsel %vm659_vm1, %v1728_v9, %v658_v13  ;;  %824 = vmatpush.msra.mxu1 %v803_v48  ;;  %1603 = vmatpush.msra.mxu3 %v803_v48  ;;  %p2002_p7 = por %p2001_p4, %p2000_p3 }
  0x4c   : > { %652 = vadd.xlane.f32.xlu0 %v651_v6  ;;  %646 = vadd.xlane.f32.xlu1 %v645_v7  ;;  %p1998_p2 = pneg %p1997_p1 }
  0x4d   : > { %788 = vmatpush.msra.mxu0 %v753_v49  ;;  %1596 = vmatpush.msra.mxu2 %v753_v49 }
  0x4e   : > { %825 = vmatpush.msra.mxu1 %v802_v50  ;;  %1604 = vmatpush.msra.mxu3 %v802_v50  ;;  %p2003_p8 = pnand %p2002_p7, %p1998_p2 }
  0x4f   : > { %855 = vmatpush.msrb.mxu2 %v846_v51 }
  0x51   : > { %856 = vmatpush.msrb.mxu2 %v845_v52 }
  0x53   : > { %857 = vmatpush.msrb.mxu2 %v844_v55 }
  0x55   : > { %858 = vmatpush.msrb.mxu2 %v843_v58  ;;  %v881_v58 = vld [vmem:[#allocation11 + $0x28] sm:$0xff] }
  0x57   : > { %859 = vmatpush.msrb.mxu2 %v842_v61  ;;  %v876_v61 = vld [vmem:[#allocation11] sm:$0xff] }
  0x59   : > { %860 = vmatpush.msrb.mxu2 %v841_v62 }
  0x5b   : > { %861 = vmatpush.msrb.mxu2 %v840_v3 }
  0x5d   : > { %862 = vmatpush.msrb.mxu2 %v839_v8 }
  0xb7   : > { %v650_v15 = vpop.xlane.xlu0 %649  ;;  %v644_v16 = vpop.xlane.xlu1 %643 }
  0xb8   : > { %v663_v17 = vmul.f32 %v2308_v14, %v650_v15  ;;  %v661_v18 = vmul.f32 %v2308_v14, %v644_v16 }
  0xba   : > { %v2313_v19 = vsub.f32 %v2292_v0, %v663_v17  ;;  %v2316_v20 = vsub.f32 %v2294_v1, %v661_v18 }
  0xbc   : > { %v671_v21 = vmul.f32 %v2313_v19, %v2313_v19  ;;  %v669_v22 = vmul.f32 %v2316_v20, %v2316_v20 }
  0xbe   : > { %v679_v23 = vsel %vm641_vm0, %v671_v21, 0.0  ;;  %v673_v24 = vsel %vm641_vm0, %v669_v22, 0.0 }
  0xbf   : > { %680 = vadd.xlane.f32.xlu2 %v679_v23  ;;  %v653_v25 = vpop.xlane.xlu0 %652  ;;  %674 = vadd.xlane.f32.xlu0 %v673_v24  ;;  %v647_v26 = vpop.xlane.xlu1 %646 }
  0xc0   : > { %v664_v27 = vmul.f32 %v2308_v14, %v653_v25  ;;  %v662_v28 = vmul.f32 %v2308_v14, %v647_v26 }
  0xc2   : > { %v2327_v29 = vsub.f32 %v2300_v4, %v664_v27  ;;  %v2330_v30 = vsub.f32 %v2302_v5, %v662_v28 }
  0xc4   : > { %v672_v31 = vmul.f32 %v2327_v29, %v2327_v29  ;;  %v670_v32 = vmul.f32 %v2330_v30, %v2330_v30 }
  0xc6   : > { %v682_v33 = vsel %vm641_vm0, %v672_v31, 0.0  ;;  %v676_v34 = vsel %vm641_vm0, %v670_v32, 0.0  ;;  %v1720_v32 = vld [vmem:[#allocation2] ss:$0 sm:$0xff] }
  0xc7   : > { %683 = vadd.xlane.f32.xlu2 %v682_v33  ;;  %677 = vadd.xlane.f32.xlu1 %v676_v34 }
 0x132   : > { %v681_v53 = vpop.xlane.xlu2 %680  ;;  %v675_v54 = vpop.xlane.xlu0 %674 }
 0x133   : > { %v687_v56 = vmul.f32 %v681_v53, %v2308_v14  ;;  %v685_v57 = vmul.f32 %v675_v54, %v2308_v14 }
 0x135   : > { %v691_v59 = vadd.f32 1e-05, %v687_v56  ;;  %v689_v60 = vadd.f32 1e-05, %v685_v57  ;;  %v883_v56 = vld [vmem:[#allocation11 + $0x38] sm:$0xff]  ;;  %v882_v57 = vld [vmem:[#allocation11 + $0x30] sm:$0xff] }
 0x136   : > { %908 = vmatpush.msrb.mxu3 %v883_v56 }
 0x137   : > { %1729 = vrsqrt.f32 %v691_v59  ;;  %vm699_vm3 = vweird.f32 %v689_v60  ;;  %vm719_vm5 = vweird.f32 %v691_v59 }
 0x138   : > { %1731 = vrsqrt.f32 %v689_v60  ;;  %909 = vmatpush.msrb.mxu3 %v882_v57 }
 0x13a   : > { %v684_v63 = vpop.xlane.xlu2 %683  ;;  %v678_v2 = vpop.xlane.xlu1 %677  ;;  %910 = vmatpush.msrb.mxu3 %v881_v58 }
 0x13b   : > { %v688_v6 = vmul.f32 %v684_v63, %v2308_v14  ;;  %v686_v7 = vmul.f32 %v678_v2, %v2308_v14 }
 0x13d   : > { %v1730_v9 = vpop.eup %1729  ;;  %v692_v10 = vadd.f32 1e-05, %v688_v6  ;;  %v690_v11 = vadd.f32 1e-05, %v686_v7 }
 0x13e   : > { %v1732_v12 = vpop.eup %1731  ;;  %v714_v13 = vmul.f32 %v1730_v9, %v691_v59  ;;  %vm720_vm2 = vweird.f32 %v1730_v9  ;;  %v878_v59 = vld [vmem:[#allocation11 + $0x10] sm:$0xff] }
 0x13f   : > { %v694_v15 = vmul.f32 %v1732_v12, %v689_v60  ;;  %1733 = vrsqrt.f32 %v692_v10  ;;  %vm700_vm4 = vweird.f32 %v1732_v12  ;;  %vm721_vm6 = vmor %vm719_vm5, %vm720_vm2  ;;  %vm709_vm9 = vweird.f32 %v690_v11  ;;  %v877_v60 = vld [vmem:[#allocation11 + $0x8] sm:$0xff] }
 0x140   : > { %v715_v16 = vmul.f32 %v1730_v9, %v714_v13  ;;  %1735 = vrsqrt.f32 %v690_v11  ;;  %vm701_vm7 = vmor %vm699_vm3, %vm700_vm4  ;;  %vm729_vm11 = vweird.f32 %v692_v10  ;;  %v929_v13 = vld [vmem:[#allocation13] sm:$0xff] }
 0x141   : > { %v695_v17 = vmul.f32 %v1732_v12, %v694_v15 }
 0x142   : > { %v716_v18 = vmul.f32 0.5, %v715_v16 }
 0x143   : > { %v696_v21 = vmul.f32 0.5, %v695_v17  ;;  %v930_v17 = vld [vmem:[#allocation13 + $0x8] sm:$0xff] }
 0x144   : > { %v717_v22 = vsub.f32 1.5, %v716_v18 }
 0x145   : > { %v1734_v23 = vpop.eup %1733  ;;  %v697_v24 = vsub.f32 1.5, %v696_v21  ;;  %v931_v21 = vld [vmem:[#allocation13 + $0x10] sm:$0xff] }
 0x146   : > { %v1736_v25 = vpop.eup %1735  ;;  %v718_v26 = vmul.f32 %v1730_v9, %v717_v22  ;;  %v724_v27 = vmul.f32 %v1734_v23, %v692_v10  ;;  %vm730_vm8 = vweird.f32 %v1734_v23 }
 0x147   : > { %v698_v28 = vmul.f32 %v1732_v12, %v697_v24  ;;  %v704_v31 = vmul.f32 %v1736_v25, %v690_v11  ;;  %vm710_vm10 = vweird.f32 %v1736_v25  ;;  %vm731_vm12 = vmor %vm729_vm11, %vm730_vm8 }
 0x148   : > { %v722_v33 = vsel %vm721_vm6, %v1730_v9, %v718_v26  ;;  %v725_v34 = vmul.f32 %v1734_v23, %v724_v27  ;;  %vm711_vm13 = vmor %vm709_vm9, %vm710_vm10 }
 0x149   : > { %v702_v35 = vsel %vm701_vm7, %v1732_v12, %v698_v28  ;;  %v705_v36 = vmul.f32 %v1736_v25, %v704_v31  ;;  %v735_v38 = vmul.f32 %v722_v33, %v2313_v19 }
 0x14a   : > { %v726_v39 = vmul.f32 0.5, %v725_v34  ;;  %v733_v40 = vmul.f32 %v702_v35, %v2316_v20  ;;  %v1108_v35 = vld [vmem:[#allocation10 + $0x38] sm:$0xff] }
 0x14b   : > { %v706_v41 = vmul.f32 0.5, %v705_v36  ;;  %v743_v42 = vmul.f32 %v1720_v32, %v735_v38  ;;  %v1107_v36 = vld [vmem:[#allocation10 + $0x30] sm:$0xff]  ;;  %v1105_v38 = vld [vmem:[#allocation10 + $0x20] sm:$0xff] }
 0x14c   : > { %v727_v43 = vsub.f32 1.5, %v726_v39  ;;  %v741_v44 = vmul.f32 %v1720_v32, %v733_v40  ;;  %v1104_v39 = vld [vmem:[#allocation10 + $0x18] sm:$0xff]  ;;  %v1103_v40 = vld [vmem:[#allocation10 + $0x10] sm:$0xff] }
 0x14d   : > { %v707_v45 = vsub.f32 1.5, %v706_v41  ;;  %v751_v46 = vadd.f32 %v1721_v37, %v743_v42  ;;  %v1102_v41 = vld [vmem:[#allocation10 + $0x8] sm:$0xff]  ;;  %v1101_v42 = vld [vmem:[#allocation10] sm:$0xff] }
 0x14e   : > { %v728_v47 = vmul.f32 %v1734_v23, %v727_v43  ;;  %v749_v48 = vadd.f32 %v1721_v37, %v741_v44 }
 0x14f   : > { %v708_v49 = vmul.f32 %v1736_v25, %v707_v45  ;;  %1545 = vmatmul.msk.f32.vlgmr.msra.gmra.mxu2 %vm641_vm0, %v751_v46  ;;  %1549 = vmatmul.msk.f32.vlgmr.msra.gmra.mxu3 %vm641_vm0, %v751_v46 }
 0x150   : > { %v732_v19 = vsel %vm731_vm12, %v1734_v23, %v728_v47  ;;  %1543 = vmatmul.msk.f32.vlgmr.msra.gmra.mxu0 %vm641_vm0, %v749_v48  ;;  %1547 = vmatmul.msk.f32.vlgmr.msra.gmra.mxu1 %vm641_vm0, %v749_v48  ;;  %v932_v23 = vld [vmem:[#allocation13 + $0x18] sm:$0xff]  ;;  %vm1325_vm12 = vcmask 130048  }
 0x151   : > { %v712_v20 = vsel %vm711_vm13, %v1736_v25, %v708_v49  ;;  %v736_v50 = vmul.f32 %v732_v19, %v2327_v29  ;;  %1028 = vmatpush.msra.mxu2 %v883_v56  ;;  %v880_v29 = vld [vmem:[#allocation11 + $0x20] sm:$0xff] }
 0x152   : > { %v734_v51 = vmul.f32 %v712_v20, %v2330_v30  ;;  %v879_v30 = vld [vmem:[#allocation11 + $0x18] sm:$0xff]  ;;  %911 = vmatpush.msrb.mxu3 %v880_v29 }
 0x153   : > { %v744_v52 = vmul.f32 %v1720_v32, %v736_v50  ;;  %1029 = vmatpush.msra.mxu2 %v882_v57 }
 0x154   : > { %v742_v53 = vmul.f32 %v1720_v32, %v734_v51  ;;  %912 = vmatpush.msrb.mxu3 %v879_v30 }
 0x155   : > { %v752_v54 = vadd.f32 %v1721_v37, %v744_v52  ;;  %1030 = vmatpush.msra.mxu2 %v881_v58 }
 0x156   : > { %v750_v55 = vadd.f32 %v1721_v37, %v742_v53  ;;  %913 = vmatpush.msrb.mxu3 %v878_v59  ;;  %v1106_v37 = vld [vmem:[#allocation10 + $0x28] sm:$0xff] }
 0x157   : > { %1546 = vmatmul.msk.f32.gmra.mxu2 %vm641_vm0, %v752_v54  ;;  %1550 = vmatmul.msk.f32.gmra.mxu3 %vm641_vm0, %v752_v54 }
 0x158   : > { %1544 = vmatmul.msk.f32.gmra.mxu0 %vm641_vm0, %v750_v55  ;;  %1548 = vmatmul.msk.f32.gmra.mxu1 %vm641_vm0, %v750_v55 }
 0x159   : > { %1031 = vmatpush.msra.mxu2 %v880_v29  ;;  %914 = vmatpush.msrb.mxu3 %v877_v60 }
 0x15b   : > { %1032 = vmatpush.msra.mxu2 %v879_v30  ;;  %915 = vmatpush.msrb.mxu3 %v876_v61 }
 0x15d   : > { %1033 = vmatpush.msra.mxu2 %v878_v59  ;;  %1133 = vmatpush.msra.mxu3 %v1108_v35 }
 0x15f   : > { %1551 = vmatmul.msk.f32.vlgmr.msrb.gmra.mxu2 %vm641_vm0, %v749_v48  ;;  %1134 = vmatpush.msra.mxu3 %v1107_v36 }
 0x160   : > { %1034 = vmatpush.msra.mxu2 %v877_v60 }
 0x161   : > { %1135 = vmatpush.msra.mxu3 %v1106_v37 }
 0x162   : > { %1035 = vmatpush.msra.mxu2 %v876_v61 }
 0x163   : > { %1136 = vmatpush.msra.mxu3 %v1105_v38 }
 0x165   : > { %1137 = vmatpush.msra.mxu3 %v1104_v39 }
 0x167   : > { %1552 = vmatmul.msk.f32.gmra.mxu2 %vm641_vm0, %v750_v55  ;;  %1138 = vmatpush.msra.mxu3 %v1103_v40 }
 0x169   : > { %1139 = vmatpush.msra.mxu3 %v1102_v41 }
 0x16b   : > { %1140 = vmatpush.msra.mxu3 %v1101_v42 }
 0x16f   : > { %1553 = vmatmul.msk.f32.gmra.mxu2 %vm641_vm0, %v751_v46 }
 0x177   : > { %1554 = vmatmul.msk.f32.gmra.mxu2 %vm641_vm0, %v752_v54 }
 0x1cd   : > { %v790_v62 = vpop.f32.mrf.mxu0  ;;  %v827_v63 = vpop.f32.mrf.mxu1 }
 0x1ce   : > { %v884_v2 = vmul.f32 %v827_v63, %v790_v62 }
 0x1d0   : > { %1555 = vmatmul.msk.f32.vlgmr.msrb.gmra.mxu3 %vm641_vm0, %v884_v2 }
 0x1d2   : > { %v796_v3 = vpop.f32.mrf.mxu2  ;;  %v833_v6 = vpop.f32.mrf.mxu3 }
 0x1d3   : > { %v886_v12 = vmul.f32 %v833_v6, %v796_v3 }
 0x1d5   : > { %v793_v7 = vpop.f32.mrf.mxu0  ;;  %v830_v8 = vpop.f32.mrf.mxu1 }
 0x1d6   : > { %v885_v9 = vmul.f32 %v830_v8, %v793_v7 }
 0x1d8   : > { %1556 = vmatmul.msk.f32.gmra.mxu3 %vm641_vm0, %v885_v9 }
 0x1da   : > { %v799_v10 = vpop.f32.mrf.mxu2  ;;  %v836_v11 = vpop.f32.mrf.mxu3 }
 0x1db   : > { %958 = vmatpush.msrb.mxu0 %v836_v11  ;;  %v887_v16 = vmul.f32 %v836_v11, %v799_v10 }
 0x1dd   : > { %959 = vmatpush.msrb.mxu0 %v833_v6 }
 0x1df   : > { %960 = vmatpush.msrb.mxu0 %v830_v8 }
 0x1e0   : > { %1557 = vmatmul.msk.f32.gmra.mxu3 %vm641_vm0, %v886_v12 }
 0x1e1   : > { %961 = vmatpush.msrb.mxu0 %v827_v63 }
 0x1e2   : > { %v2364_v15 = vpop.f32.mrf.mxu2  ;;  %1559 = vmatmul.msk.f32.vlgmr.msrb.gmra.mxu0 %vm933_vm14, %v929_v13 }
 0x1e8   : > { %1558 = vmatmul.msk.f32.gmra.mxu3 %vm641_vm0, %v887_v16 }
 0x1ea   : > { %v2368_v18 = vpop.f32.mrf.mxu2  ;;  %1560 = vmatmul.msk.f32.gmra.mxu0 %vm933_vm14, %v930_v17 }
 0x1f2   : > { %v2371_v22 = vpop.f32.mrf.mxu2  ;;  %1561 = vmatmul.msk.f32.gmra.mxu0 %vm933_vm14, %v931_v21 }
 0x1fa   : > { %v2374_v24 = vpop.f32.mrf.mxu2  ;;  %1562 = vmatmul.msk.f32.gmra.mxu0 %vm933_vm14, %v932_v23 }
 0x1fb   : > { %987 = vmatpush.msrb.mxu1 %v2374_v24 }
 0x1fd   : > { %988 = vmatpush.msrb.mxu1 %v2371_v22 }
 0x1ff   : > { %989 = vmatpush.msrb.mxu1 %v2368_v18 }
 0x201   : > { %990 = vmatpush.msrb.mxu1 %v2364_v15 }
 0x202   : > { %1563 = vmatmul.msk.f32.vlgmr.msrb.gmra.mxu1 %vm933_vm14, %v929_v13 }
 0x20a   : > { %1564 = vmatmul.msk.f32.gmra.mxu1 %vm933_vm14, %v930_v17 }
 0x212   : > { %1565 = vmatmul.msk.f32.gmra.mxu1 %vm933_vm14, %v931_v21 }
 0x21a   : > { %1566 = vmatmul.msk.f32.gmra.mxu1 %vm933_vm14, %v932_v23 }
 0x253   : > { %v917_v43 = vpop.f32.mrf.mxu3 }
 0x25b   : > { %v920_v48 = vpop.f32.mrf.mxu3 }
 0x25f   : > { %v963_v25 = vpop.f32.mrf.mxu0 }
 0x260   : > { %v1004_v26 = vmul.f32 %v963_v25, %v790_v62 }
 0x262   : > { %1567 = vmatmul.msk.f32.vlgmr.msra.gmra.mxu2 %vm641_vm0, %v1004_v26 }
 0x263   : > { %v923_v58 = vpop.f32.mrf.mxu3 }
 0x267   : > { %v966_v27 = vpop.f32.mrf.mxu0 }
 0x268   : > { %v1005_v28 = vmul.f32 %v966_v27, %v793_v7 }
 0x26a   : > { %1568 = vmatmul.msk.f32.gmra.mxu2 %vm641_vm0, %v1005_v28 }
 0x26b   : > { %v926_v12 = vpop.f32.mrf.mxu3 }
 0x26f   : > { %v969_v31 = vpop.f32.mrf.mxu0 }
 0x270   : > { %v1006_v32 = vmul.f32 %v969_v31, %v796_v3 }
 0x272   : > { %1569 = vmatmul.msk.f32.gmra.mxu2 %vm641_vm0, %v1006_v32 }
 0x277   : > { %v972_v33 = vpop.f32.mrf.mxu0 }
 0x278   : > { %v1007_v34 = vmul.f32 %v972_v33, %v799_v10 }
 0x27a   : > { %1570 = vmatmul.msk.f32.gmra.mxu2 %vm641_vm0, %v1007_v34 }
 0x27f   : > { %v992_v51 = vpop.f32.mrf.mxu1 }
 0x287   : > { %v995_v2 = vpop.f32.mrf.mxu1 }
 0x28f   : > { %v998_v31 = vpop.f32.mrf.mxu1 }
 0x2e5   : > { %v1037_v44 = vpop.f32.mrf.mxu2 }
 0x2e6   : > { %v1049_v45 = vmax.f32 %v917_v43, %v1037_v44 }
 0x2e8   : > { %v1053_v46 = vsub.f32 %v917_v43, %v1049_v45  ;;  %v1065_v47 = vsub.f32 %v1037_v44, %v1049_v45  ;;  %v1001_v43 = vpop.f32.mrf.mxu1 }
 0x2ea   : > { %v1057_v49 = vmul.f32 1.442695, %v1053_v46  ;;  %v1069_v19 = vmul.f32 1.442695, %v1065_v47 }
 0x2ec   : > { %1737 = vpow2.f32 %v1057_v49 }
 0x2ed   : > { %1739 = vpow2.f32 %v1069_v19  ;;  %v1040_v20 = vpop.f32.mrf.mxu2 }
 0x2ee   : > { %v1050_v50 = vmax.f32 %v920_v48, %v1040_v20 }
 0x2f0   : > { %v1054_v52 = vsub.f32 %v920_v48, %v1050_v50  ;;  %v1066_v53 = vsub.f32 %v1040_v20, %v1050_v50 }
 0x2f2   : > { %v1738_v54 = vpop.eup %1737  ;;  %v1059_v55 = vmul.f32 1.442695, %v1054_v52  ;;  %v1071_v56 = vmul.f32 1.442695, %v1066_v53 }
 0x2f3   : > { %v1740_v57 = vpop.eup %1739  ;;  %v1081_v60 = vmul.f32 %v1738_v54, %v2364_v15 }
 0x2f4   : > { %v1077_v29 = vadd.f32 %v1740_v57, %v1738_v54  ;;  %1741 = vpow2.f32 %v1059_v55  ;;  %v1085_v61 = vmul.f32 %v1740_v57, %v992_v51 }
 0x2f5   : > { %1743 = vpow2.f32 %v1071_v56  ;;  %v1043_v30 = vpop.f32.mrf.mxu2 }
 0x2f6   : > { %1745 = vrcp.f32 %v1077_v29  ;;  %v1051_v59 = vmax.f32 %v923_v58, %v1043_v30  ;;  %v1089_v9 = vadd.f32 %v1085_v61, %v1081_v60 }
 0x2f8   : > { %v1055_v62 = vsub.f32 %v923_v58, %v1051_v59  ;;  %v1067_v63 = vsub.f32 %v1043_v30, %v1051_v59 }
 0x2fa   : > { %v1742_v3 = vpop.eup %1741  ;;  %v1061_v6 = vmul.f32 1.442695, %v1055_v62  ;;  %v1073_v7 = vmul.f32 1.442695, %v1067_v63 }
 0x2fb   : > { %v1744_v8 = vpop.eup %1743  ;;  %v1082_v15 = vmul.f32 %v1742_v3, %v2368_v18 }
 0x2fc   : > { %v1746_v10 = vpop.eup %1745  ;;  %v1078_v11 = vadd.f32 %v1744_v8, %v1742_v3  ;;  %1747 = vpow2.f32 %v1061_v6  ;;  %v1086_v21 = vmul.f32 %v1744_v8, %v995_v2 }
 0x2fd   : > { %v1097_v13 = vmul.f32 %v1746_v10, %v1089_v9  ;;  %1749 = vpow2.f32 %v1073_v7  ;;  %v1046_v16 = vpop.f32.mrf.mxu2 }
 0x2fe   : > { %1751 = vrcp.f32 %v1078_v11  ;;  %v1052_v17 = vmax.f32 %v926_v12, %v1046_v16  ;;  %v1090_v33 = vadd.f32 %v1086_v21, %v1082_v15  ;;  %v1269_v21 = vld [vmem:[%s2552_s10 + $0x38] sm:$0xff] }
 0x2ff   : > { %1571 = vmatmul.msk.f32.vlgmr.msra.gmra.mxu3 %vm641_vm0, %v1097_v13  ;;  %1294 = vmatpush.msra.mxu0 %v1269_v21 }
 0x300   : > { %v1056_v23 = vsub.f32 %v926_v12, %v1052_v17  ;;  %v1068_v25 = vsub.f32 %v1046_v16, %v1052_v17 }
 0x302   : > { %v1748_v26 = vpop.eup %1747  ;;  %v1063_v27 = vmul.f32 1.442695, %v1056_v23  ;;  %v1075_v28 = vmul.f32 1.442695, %v1068_v25  ;;  %v1268_v23 = vld [vmem:[%s2552_s10 + $0x30] sm:$0xff]  ;;  %v1267_v25 = vld [vmem:[%s2552_s10 + $0x28] sm:$0xff] }
 0x303   : > { %v1750_v32 = vpop.eup %1749  ;;  %v1083_v37 = vmul.f32 %v1748_v26, %v2371_v22  ;;  %v1722_v22 = vld [vmem:[%s2549_s7] ss:$0 sm:$0xff]  ;;  %1295 = vmatpush.msra.mxu0 %v1268_v23 }
 0x304   : > { %v1752_v34 = vpop.eup %1751  ;;  %v1079_v35 = vadd.f32 %v1750_v32, %v1748_v26  ;;  %1753 = vpow2.f32 %v1063_v27  ;;  %v1087_v18 = vmul.f32 %v1750_v32, %v998_v31  ;;  %v1266_v26 = vld [vmem:[%s2552_s10 + $0x20] sm:$0xff]  ;;  %v1265_v27 = vld [vmem:[%s2552_s10 + $0x18] sm:$0xff]  ;;  %v1263_v31 = vld [vmem:[%s2552_s10 + $0x8] sm:$0xff] }
 0x305   : > { %1755 = vpow2.f32 %v1075_v28  ;;  %v1098_v36 = vmul.f32 %v1752_v34, %v1090_v33  ;;  %1296 = vmatpush.msra.mxu0 %v1267_v25  ;;  %v1264_v28 = vld [vmem:[%s2552_s10 + $0x10] sm:$0xff]  ;;  %v1262_v32 = vld [vmem:[%s2552_s10] sm:$0xff] }
 0x306   : > { %1757 = vrcp.f32 %v1079_v35  ;;  %v1091_v40 = vadd.f32 %v1087_v18, %v1083_v37 }
 0x307   : > { %1572 = vmatmul.msk.f32.gmra.mxu3 %vm641_vm0, %v1098_v36  ;;  %1297 = vmatpush.msra.mxu0 %v1266_v26 }
 0x309   : > { %1298 = vmatpush.msra.mxu0 %v1265_v27 }
 0x30a   : > { %v1754_v38 = vpop.eup %1753 }
 0x30b   : > { %v1756_v39 = vpop.eup %1755  ;;  %v1084_v45 = vmul.f32 %v1754_v38, %v2374_v24  ;;  %1299 = vmatpush.msra.mxu0 %v1264_v28 }
 0x30c   : > { %v1758_v41 = vpop.eup %1757  ;;  %v1080_v42 = vadd.f32 %v1756_v39, %v1754_v38  ;;  %v1088_v46 = vmul.f32 %v1756_v39, %v1001_v43 }
 0x30d   : > { %v1099_v44 = vmul.f32 %v1758_v41, %v1091_v40  ;;  %1300 = vmatpush.msra.mxu0 %v1263_v31 }
 0x30e   : > { %1759 = vrcp.f32 %v1080_v42  ;;  %v1092_v47 = vadd.f32 %v1088_v46, %v1084_v45 }
 0x30f   : > { %1573 = vmatmul.msk.f32.gmra.mxu3 %vm641_vm0, %v1099_v44  ;;  %1301 = vmatpush.msra.mxu0 %v1262_v32 }
 0x314   : > { %v1760_v48 = vpop.eup %1759 }
 0x315   : > { %v1100_v49 = vmul.f32 %v1760_v48, %v1092_v47  ;;  %v1723_v47 = vld [vmem:[%s2550_s8] ss:$0 sm:$0xff] }
 0x317   : > { %1574 = vmatmul.msk.f32.gmra.mxu3 %vm641_vm0, %v1100_v49 }
 0x382   : > { %v1142_v19 = vpop.f32.mrf.mxu3 }
 0x383   : > { %v1143_v20 = vadd.f32 %v1722_v22, %v1142_v19  ;;  %v1319_v19 = vld [vmem:[%s2554_s12] sm:$0xff] }
 0x385   : > { %v2401_v50 = vadd.f32 %v1143_v20, %v2294_v1 }
 0x387   : > { %v1158_v24 = vsel %vm641_vm0, %v2401_v50, 0.0 }
 0x388   : > { %1159 = vadd.xlane.f32.xlu2 %v1158_v24 }
 0x38a   : > { %v1145_v51 = vpop.f32.mrf.mxu3 }
 0x38b   : > { %v1146_v52 = vadd.f32 %v1722_v22, %v1145_v51 }
 0x38d   : > { %v2406_v53 = vadd.f32 %v1146_v52, %v2302_v5  ;;  %v1724_v52 = vld [vmem:[%s2551_s9] ss:$0 sm:$0xff] }
 0x38f   : > { %v1161_v54 = vsel %vm641_vm0, %v2406_v53, 0.0 }
 0x390   : > { %1162 = vadd.xlane.f32.xlu0 %v1161_v54 }
 0x392   : > { %v1148_v55 = vpop.f32.mrf.mxu3 }
 0x393   : > { %v1149_v56 = vadd.f32 %v1722_v22, %v1148_v55 }
 0x395   : > { %v2411_v57 = vadd.f32 %v1149_v56, %v2292_v0 }
 0x397   : > { %v1164_v1 = vsel %vm641_vm0, %v2411_v57, 0.0 }
 0x398   : > { %1165 = vadd.xlane.f32.xlu1 %v1164_v1 }
 0x39a   : > { %v1151_v58 = vpop.f32.mrf.mxu3 }
 0x39b   : > { %v1152_v29 = vadd.f32 %v1722_v22, %v1151_v58  ;;  %v1320_v22 = vld [vmem:[%s2554_s12 + $0x8] sm:$0xff] }
 0x39c   : > { %1352 = vmatpush.msra.mxu1 %v1320_v22 }
 0x39d   : > { %v2416_v30 = vadd.f32 %v1152_v29, %v2300_v4 }
 0x39e   : > { %1353 = vmatpush.msra.mxu1 %v1319_v19 }
 0x39f   : > { %v1167_v5 = vsel %vm641_vm0, %v2416_v30, 0.0 }
 0x3a0   : > { %1168 = vadd.xlane.f32.xlu2 %v1167_v5 }
 0x3fb   : > { %v1160_v59 = vpop.xlane.xlu2 %1159 }
 0x3fc   : > { %v1170_v60 = vmul.f32 %v1160_v59, %v2308_v14 }
 0x3fe   : > { %v2422_v61 = vsub.f32 %v2401_v50, %v1170_v60 }
 0x400   : > { %v1178_v0 = vmul.f32 %v2422_v61, %v2422_v61 }
 0x402   : > { %v1182_v62 = vsel %vm641_vm0, %v1178_v0, 0.0 }
 0x403   : > { %v1163_v63 = vpop.xlane.xlu0 %1162  ;;  %1183 = vadd.xlane.f32.xlu0 %v1182_v62 }
 0x404   : > { %v1171_v4 = vmul.f32 %v1163_v63, %v2308_v14 }
 0x406   : > { %v2429_v2 = vsub.f32 %v2406_v53, %v1171_v4 }
 0x408   : > { %v1179_v3 = vmul.f32 %v2429_v2, %v2429_v2 }
 0x40a   : > { %v1185_v6 = vsel %vm641_vm0, %v1179_v3, 0.0 }
 0x40b   : > { %v1166_v7 = vpop.xlane.xlu1 %1165  ;;  %1186 = vadd.xlane.f32.xlu1 %v1185_v6 }
 0x40c   : > { %v1172_v8 = vmul.f32 %v1166_v7, %v2308_v14 }
 0x40e   : > { %v2436_v9 = vsub.f32 %v2411_v57, %v1172_v8 }
 0x410   : > { %v1180_v10 = vmul.f32 %v2436_v9, %v2436_v9 }
 0x412   : > { %v1188_v11 = vsel %vm641_vm0, %v1180_v10, 0.0 }
 0x413   : > { %1189 = vadd.xlane.f32.xlu2 %v1188_v11  ;;  %v1169_v12 = vpop.xlane.xlu2 %1168 }
 0x414   : > { %v1173_v13 = vmul.f32 %v1169_v12, %v2308_v14 }
 0x416   : > { %v2443_v16 = vsub.f32 %v2416_v30, %v1173_v13 }
 0x418   : > { %v1181_v17 = vmul.f32 %v2443_v16, %v2443_v16 }
 0x41a   : > { %v1191_v15 = vsel %vm641_vm0, %v1181_v17, 0.0 }
 0x41b   : > { %1192 = vadd.xlane.f32.xlu0 %v1191_v15 }
 0x476   : > { %v1184_v33 = vpop.xlane.xlu0 %1183 }
 0x477   : > { %v1194_v34 = vmul.f32 %v1184_v33, %v2308_v14 }
 0x479   : > { %v1198_v35 = vadd.f32 1e-05, %v1194_v34 }
 0x47b   : > { %1761 = vrsqrt.f32 %v1198_v35  ;;  %vm1208_vm1 = vweird.f32 %v1198_v35 }
 0x47e   : > { %v1187_v36 = vpop.xlane.xlu1 %1186 }
 0x47f   : > { %v1195_v37 = vmul.f32 %v1187_v36, %v2308_v14 }
 0x481   : > { %v1762_v18 = vpop.eup %1761  ;;  %v1199_v38 = vadd.f32 1e-05, %v1195_v37 }
 0x482   : > { %v1203_v39 = vmul.f32 %v1762_v18, %v1198_v35  ;;  %vm1209_vm15 = vweird.f32 %v1762_v18 }
 0x483   : > { %1763 = vrsqrt.f32 %v1199_v38  ;;  %vm1210_vm2 = vmor %vm1208_vm1, %vm1209_vm15  ;;  %vm1218_vm4 = vweird.f32 %v1199_v38 }
 0x484   : > { %v1204_v40 = vmul.f32 %v1762_v18, %v1203_v39 }
 0x486   : > { %v1205_v41 = vmul.f32 0.5, %v1204_v40  ;;  %v1190_v42 = vpop.xlane.xlu2 %1189 }
 0x487   : > { %v1196_v43 = vmul.f32 %v1190_v42, %v2308_v14 }
 0x488   : > { %v1206_v44 = vsub.f32 1.5, %v1205_v41  ;;  %v1726_v41 = vld [vmem:[%s2555_s13] ss:$0 sm:$0xff] }
 0x489   : > { %v1764_v45 = vpop.eup %1763  ;;  %v1200_v46 = vadd.f32 1e-05, %v1196_v43 }
 0x48a   : > { %v1207_v48 = vmul.f32 %v1762_v18, %v1206_v44  ;;  %v1213_v49 = vmul.f32 %v1764_v45, %v1199_v38  ;;  %vm1219_vm3 = vweird.f32 %v1764_v45 }
 0x48b   : > { %1765 = vrsqrt.f32 %v1200_v46  ;;  %vm1220_vm5 = vmor %vm1218_vm4, %vm1219_vm3  ;;  %vm1228_vm7 = vweird.f32 %v1200_v46 }
 0x48c   : > { %v1211_v20 = vsel %vm1210_vm2, %v1762_v18, %v1207_v48  ;;  %v1214_v24 = vmul.f32 %v1764_v45, %v1213_v49 }
 0x48d   : > { %v1242_v51 = vmul.f32 %v1211_v20, %v2422_v61 }
 0x48e   : > { %v1215_v54 = vmul.f32 0.5, %v1214_v24  ;;  %v1193_v55 = vpop.xlane.xlu0 %1192 }
 0x48f   : > { %v1250_v56 = vmul.f32 %v1723_v47, %v1242_v51  ;;  %v1197_v1 = vmul.f32 %v1193_v55, %v2308_v14 }
 0x490   : > { %v1216_v58 = vsub.f32 1.5, %v1215_v54 }
 0x491   : > { %v1766_v29 = vpop.eup %1765  ;;  %v1201_v5 = vadd.f32 1e-05, %v1197_v1  ;;  %v1258_v59 = vadd.f32 %v1724_v52, %v1250_v56 }
 0x492   : > { %v1217_v60 = vmul.f32 %v1764_v45, %v1216_v58  ;;  %v1223_v0 = vmul.f32 %v1766_v29, %v1200_v46  ;;  %vm1229_vm6 = vweird.f32 %v1766_v29 }
 0x493   : > { %1767 = vrsqrt.f32 %v1201_v5  ;;  %1575 = vmatmul.msk.f32.vlgmr.msra.gmra.mxu0 %vm641_vm0, %v1258_v59  ;;  %vm1230_vm8 = vmor %vm1228_vm7, %vm1229_vm6  ;;  %vm1238_vm10 = vweird.f32 %v1201_v5 }
 0x494   : > { %v1221_v61 = vsel %vm1220_vm5, %v1764_v45, %v1217_v60  ;;  %v1224_v62 = vmul.f32 %v1766_v29, %v1223_v0 }
 0x495   : > { %v1243_v63 = vmul.f32 %v1221_v61, %v2429_v2 }
 0x496   : > { %v1225_v4 = vmul.f32 0.5, %v1224_v62 }
 0x497   : > { %v1251_v3 = vmul.f32 %v1723_v47, %v1243_v63 }
 0x498   : > { %v1226_v6 = vsub.f32 1.5, %v1225_v4 }
 0x499   : > { %v1768_v14 = vpop.eup %1767  ;;  %v1259_v7 = vadd.f32 %v1724_v52, %v1251_v3 }
 0x49a   : > { %v1227_v8 = vmul.f32 %v1766_v29, %v1226_v6  ;;  %v1233_v10 = vmul.f32 %v1768_v14, %v1201_v5  ;;  %vm1239_vm9 = vweird.f32 %v1768_v14 }
 0x49b   : > { %1576 = vmatmul.msk.f32.gmra.mxu0 %vm641_vm0, %v1259_v7  ;;  %vm1240_vm11 = vmor %vm1238_vm10, %vm1239_vm9 }
 0x49c   : > { %v1231_v11 = vsel %vm1230_vm8, %v1766_v29, %v1227_v8  ;;  %v1234_v12 = vmul.f32 %v1768_v14, %v1233_v10 }
 0x49d   : > { %v1244_v13 = vmul.f32 %v1231_v11, %v2436_v9  ;;  %v1725_v9 = vld [vmem:[%s2553_s11] ss:$0 sm:$0xff] }
 0x49e   : > { %v1235_v17 = vmul.f32 0.5, %v1234_v12 }
 0x49f   : > { %v1252_v15 = vmul.f32 %v1723_v47, %v1244_v13 }
 0x4a0   : > { %v1236_v21 = vsub.f32 1.5, %v1235_v17 }
 0x4a1   : > { %v1260_v2 = vadd.f32 %v1724_v52, %v1252_v15 }
 0x4a2   : > { %v1237_v23 = vmul.f32 %v1768_v14, %v1236_v21 }
 0x4a3   : > { %1577 = vmatmul.msk.f32.gmra.mxu0 %vm641_vm0, %v1260_v2 }
 0x4a4   : > { %v1241_v25 = vsel %vm1240_vm11, %v1768_v14, %v1237_v23 }
 0x4a5   : > { %v1245_v26 = vmul.f32 %v1241_v25, %v2443_v16 }
 0x4a7   : > { %v1253_v27 = vmul.f32 %v1723_v47, %v1245_v26 }
 0x4a9   : > { %v1261_v28 = vadd.f32 %v1724_v52, %v1253_v27 }
 0x4ab   : > { %1578 = vmatmul.msk.f32.gmra.mxu0 %vm641_vm0, %v1261_v28 }
 0x510   : > { %v1303_v31 = vpop.f32.mrf.mxu0 }
 0x511   : > { %v1304_v32 = vadd.f32 %v1725_v9, %v1303_v31 }
 0x513   : > { %v1315_v33 = vmax.f32 %v1304_v32, 0.0 }
 0x515   : > { %1579 = vmatmul.msk.f32.vlgmr.msra.gmra.mxu1 %vm1325_vm12, %v1315_v33 }
 0x518   : > { %v1306_v34 = vpop.f32.mrf.mxu0 }
 0x519   : > { %v1307_v35 = vadd.f32 %v1725_v9, %v1306_v34 }
 0x51b   : > { %v1316_v36 = vmax.f32 %v1307_v35, 0.0 }
 0x51d   : > { %1580 = vmatmul.msk.f32.gmra.mxu1 %vm1325_vm12, %v1316_v36 }
 0x520   : > { %v1309_v37 = vpop.f32.mrf.mxu0 }
 0x521   : > { %v1310_v16 = vadd.f32 %v1725_v9, %v1309_v37 }
 0x523   : > { %v1317_v18 = vmax.f32 %v1310_v16, 0.0 }
 0x525   : > { %1581 = vmatmul.msk.f32.gmra.mxu1 %vm1325_vm12, %v1317_v18 }
 0x528   : > { %v1312_v38 = vpop.f32.mrf.mxu0 }
 0x529   : > { %v1313_v39 = vadd.f32 %v1725_v9, %v1312_v38 }
 0x52b   : > { %v1318_v40 = vmax.f32 %v1313_v39, 0.0 }
 0x52d   : > { %1582 = vmatmul.msk.f32.gmra.mxu1 %vm1325_vm12, %v1318_v40 }
 0x592   : > { %v1355_v42 = vpop.f32.mrf.mxu1 }
 0x593   : > { %v1356_v43 = vadd.f32 %v1726_v41, %v1355_v42 }
 0x595   : > { %v1367_v44 = vadd.f32 %v1356_v43, %v2401_v50 }
 0x597   : > { %1371 = vst.msk [vmem:[%s629_s17] sm:$0xff] %vm641_vm0, %v1367_v44 }
 0x59a   : > { %v1358_v45 = vpop.f32.mrf.mxu1 }
 0x59b   : > { %v1359_v46 = vadd.f32 %v1726_v41, %v1358_v45 }
 0x59d   : > { %v1368_v47 = vadd.f32 %v1359_v46, %v2406_v53 }
 0x59f   : > { %1372 = vst.msk [vmem:[%s629_s17 + $0x8] sm:$0xff] %vm641_vm0, %v1368_v47 }
 0x5a2   : > { %v1361_v48 = vpop.f32.mrf.mxu1 }
 0x5a3   : > { %v1362_v49 = vadd.f32 %v1726_v41, %v1361_v48 }
 0x5a5   : > { %v1369_v22 = vadd.f32 %v1362_v49, %v2411_v57 }
 0x5a7   : > { %1373 = vst.msk [vmem:[%s629_s17 + $0x10] sm:$0xff] %vm641_vm0, %v1369_v22 }
 0x5aa   : > { %v1364_v50 = vpop.f32.mrf.mxu1 }
 0x5ab   : > { %v1365_v19 = vadd.f32 %v1726_v41, %v1364_v50 }
 0x5ad   : > { %v1370_v53 = vadd.f32 %v1365_v19, %v2416_v30 }
 0x5af   : > { %1374 = vst.msk [vmem:[%s629_s17 + $0x18] sm:$0xff] %vm641_vm0, %v1370_v53 }
 0x5b0   : > { %2006 = shalt.err (!%p2003_p8)
}
 0x5b1   : > { %s2069_s18 = smov 128   ;;  %s2070_s17 = smov 8  }
 0x5b2   : > { %1633 = dma.vmem_to_hbm [thread:$0]  (%p2194_p5), %s1389_s29, 512, %s1391_s5, %s1376_s25, %s2069_s18, %s2069_s18, %s2070_s17  }
 0x5b3 PF: > { %s2590_s16 = sld [smem:[#allocation22_spill]] }
 0x5b4   : > { %s2591_s23 = sld [smem:[#allocation20_spill]] }
 0x5b9   : > { %p1675_p9 = scmp.ge.s32.totalorder %s2590_s16, 2 }
 0x5ba   : > { %s1405_s21 = sand.u32 1, %s2591_s23  }
 0x5bb   : > { %p1658_p10 = pnand %p1675_p9, %p2198_p6  ;;  %s1406_s1 = scalar_lea.sflag [#allocation4], %s1405_s21 }
 0x5bd   : > { %p1659_p11 = pneg %p1658_p10 }
 0x5bf   : > { %2040 = dma.done.wait (%p1659_p11), %s1406_s1, 512  }
 0x5c0   : > { %2042 = vsyncadd (%p1659_p11), %s1406_s1, 4294966784  ;;  %s2593_s24 = sld [smem:[#allocation23_spill]]  ;;  %s2596_s21 = smov %s2049_s22 }
 0x5c1   : > { %s2594_s28 = sld [smem:[#allocation21_spill]] }
 0x5c2   : > { %s2595_s23 = sld [smem:[#allocation24_spill]] }
 0x5c6   : > { %p30_p12 = scmp.ge.s32.totalorder %s2593_s24, 4  }
 0x5c7   : > { %s2597_s22 = smov %s2594_s28 }
 0x5c8   :  { %32 = sbr.rel (!%p30_p12) target bundleno = 13 (0xd), region = 148 }
 0x5cd   :  { %1412 = vsyncpa [#allocation3], 1 }
 0x5ce   :  { %1414 = vsyncpa [#allocation3 + $0x1], 1 }
 0x5cf   :  { %1415 = vsyncpa [#allocation6], 1 }
 0x5d0   :  { %1416 = vsyncpa [#allocation9], 1 }
 0x5d1   :  { %1417 = vsyncpa [#allocation12], 1 }
 0x5d2   :  { %1418 = vsyncpa [#allocation4], 1 }
 0x5d3   :  { %1420 = vsyncpa [#allocation4 + $0x1], 1 }

</bundles_post_ra>
